<compile_context>
chip_gen: v7x
topology: tpu7x:2x2x1
jax: 0.10.0
libtpu: 0.0.40
codegen_flags: <defaults>
</compile_context>

<pallas_src>
import functools

import jax
import jax.numpy as jnp
from jax.experimental import pallas as pl
from jax.experimental.pallas import tpu as pltpu


def _user_emb_kernel(idx_ref, w_ref, out_ref, *, n_age, k_tot, pack):
    """idx_ref: (tb, 2*pack) int32   -- pack (age, loc) index pairs per row
       w_ref:   (pack*k_tot, pack*2D) block-diagonal fused embedding table
       out_ref: (tb, pack*2D)        -- lane-dense output slab
    """
    idx = idx_ref[...]                                        # (tb, 2*pack)
    tb = idx.shape[0]
    width = pack * k_tot

    iota = jax.lax.broadcasted_iota(jnp.int32, (tb, width), 1)
    hit = jnp.zeros((tb, width), dtype=jnp.bool_)
    for p in range(pack):  # unrolled at trace time (pack is a tiny Python int)
        age = idx[:, 2 * p: 2 * p + 1] + (p * k_tot)              # age block
        loc = idx[:, 2 * p + 1: 2 * p + 2] + (p * k_tot + n_age)  # loc block
        hit = hit | (age == iota) | (loc == iota)
    # 0/1 are exact in bf16 -> build the one-hot in the table dtype so the
    # matmul runs at full MXU rate; accumulation stays f32.
    one_hot = hit.astype(w_ref.dtype)                          # (tb, pack*k_tot)

    # Single MXU matmul: gathers age+location rows AND concatenates them.
    out_ref[...] = jnp.dot(
        one_hot, w_ref[...], preferred_element_type=jnp.float32
    ).astype(out_ref.dtype)


def _pick_pack(out_w):
    """Rows packed per output row so the stored lane width is a multiple of 128."""
    if out_w % 128 == 0:
        return 1
    if 128 % out_w == 0:
        return 128 // out_w
    return 1  # awkward D: fall back to masked stores


def _build_fused_table(emb_age, emb_location, pack, table_dtype):
    """block_diag(pack copies of [[emb_age, 0], [0, emb_location]])."""
    n_age, D = emb_age.shape
    n_loc, _ = emb_location.shape
    k_tot = n_age + n_loc
    out_w = 2 * D
    W = jnp.zeros((k_tot, out_w), dtype=table_dtype)
    W = W.at[:n_age, :D].set(emb_age.astype(table_dtype))
    W = W.at[n_age:, D:].set(emb_location.astype(table_dtype))
    Wp = jnp.zeros((pack * k_tot, pack * out_w), dtype=table_dtype)
    for p in range(pack):
        Wp = Wp.at[p * k_tot:(p + 1) * k_tot, p * out_w:(p + 1) * out_w].set(W)
    return Wp


def _forward(x1, Wp, *, n_age, k_tot, D, pack, tb_cap, out_dtype):
    B = x1.shape[0]
    out_w = 2 * D

    # cdiv grid sizing + zero-index padding (index 0 is always valid; padded
    # rows are sliced away below) -- no divisibility requirement on B.
    rows = pl.cdiv(B, pack)
    tb = min(tb_cap, rows)
    grid_n = pl.cdiv(rows, tb)
    rows_pad = grid_n * tb
    b_pad = rows_pad * pack

    idx = x1.astype(jnp.int32)
    if b_pad != B:
        idx = jnp.pad(idx, ((0, b_pad - B), (0, 0)))
    idx = idx.reshape(rows_pad, 2 * pack)   # free row-major relayout

    table_shape = (pack * k_tot, pack * out_w)
    table_bytes = Wp.size * Wp.dtype.itemsize
    out_itemsize = jnp.dtype(out_dtype).itemsize

    # Large tables (non-toy sizes): single-buffer the constant table block and
    # raise the scoped-VMEM limit so v7x's 64 MiB budget is respected.
    single_buffer_table = table_bytes > (4 << 20)
    table_kwargs = {}
    if single_buffer_table:
        table_kwargs["pipeline_mode"] = pl.Buffered(1)

    compiler_kwargs = dict(dimension_semantics=("parallel",))
    vmem_needed = (table_bytes * (1 if single_buffer_table else 2)
                   + 2 * tb * 2 * pack * 4
                   + 2 * tb * pack * out_w * out_itemsize)
    if vmem_needed > (24 << 20):
        compiler_kwargs["vmem_limit_bytes"] = min(int(vmem_needed * 3 // 2), 56 << 20)

    kern = functools.partial(_user_emb_kernel, n_age=n_age, k_tot=k_tot, pack=pack)

    out = pl.pallas_call(
        kern,
        out_shape=jax.ShapeDtypeStruct((rows_pad, pack * out_w), out_dtype),
        grid_spec=pltpu.PrefetchScalarGridSpec(
            num_scalar_prefetch=0,
            grid=(grid_n,),
            in_specs=[
                # tiny index block (last dim == full dim, so shape is legal)
                pl.BlockSpec((tb, 2 * pack), lambda i: (i, 0)),
                # fused table resident in VMEM, constant across the grid
                pl.BlockSpec(table_shape, lambda i: (0, 0), **table_kwargs),
            ],
            out_specs=pl.BlockSpec((tb, pack * out_w), lambda i: (i, 0)),
        ),
        compiler_params=pltpu.CompilerParams(**compiler_kwargs),
    )(idx, Wp)

    # Free relayout back to the PyTorch output shape; drop padded rows.
    return out.reshape(b_pad, out_w)[:B]


def make_bk_user_emb(emb_age, emb_location, *, tb_rows=2048,
                     table_dtype=None, out_dtype=None):
    """Build the fused table ONCE and return a jitted forward(x1) -> (B, 2*D).

    table_dtype: dtype of the fused table / one-hot (bf16 halves DMA+VMEM).
    out_dtype:   output dtype (bf16 halves the output-write bytes on v5e).
    """
    n_age, D = emb_age.shape
    n_loc, D2 = emb_location.shape
    assert D == D2, "both embedding tables must share embedding_dim"
    k_tot = n_age + n_loc
    pack = _pick_pack(2 * D)
    if table_dtype is None:
        table_dtype = emb_age.dtype
    if out_dtype is None:
        out_dtype = emb_age.dtype

    Wp = _build_fused_table(emb_age, emb_location, pack, table_dtype)

    @jax.jit
    def forward(x1):
        return _forward(x1, Wp, n_age=n_age, k_tot=k_tot, D=D, pack=pack,
                        tb_cap=tb_rows, out_dtype=out_dtype)

    return forward


def reference(x1, emb_age, emb_location):
    age_emb = emb_age[x1[:, 0]]
    loc_emb = emb_location[x1[:, 1]]
    return jnp.concatenate([age_emb, loc_emb], axis=1)


if __name__ == "__main__":
    # config: n_age_bk=8, n_location=16, embedding_dim=32; batch=16
    n_age_bk = 8
    n_location = 16
    embedding_dim = 32
    B = 16

    key = jax.random.PRNGKey(0)
    k1, k2, k3, k4 = jax.random.split(key, 4)

    # nn.Embedding default init: N(0, 1)
    emb_age = jax.random.normal(k1, (n_age_bk, embedding_dim), dtype=jnp.float32)
    emb_location = jax.random.normal(k2, (n_location, embedding_dim), dtype=jnp.float32)

    age_idx = jax.random.randint(k3, (B, 1), 0, n_age_bk, dtype=jnp.int32)
    loc_idx = jax.random.randint(k4, (B, 1), 0, n_location, dtype=jnp.int32)
    x1 = jnp.concatenate([age_idx, loc_idx], axis=1)  # (B, 2) int32

    fwd = make_bk_user_emb(emb_age, emb_location)     # table built once here

    out = jax.block_until_ready(fwd(x1))
    ref = reference(x1, emb_age, emb_location)
    assert out.shape == (B, 2 * embedding_dim), out.shape
    assert jnp.allclose(out, ref, atol=1e-6), "mismatch vs reference gather"

    # odd batch size exercises the cdiv/padding path (no divisibility asserts)
    out_odd = jax.block_until_ready(fwd(x1[:7]))
    assert out_odd.shape == (7, 2 * embedding_dim), out_odd.shape
    assert jnp.allclose(out_odd, ref[:7], atol=1e-6), "mismatch on odd batch"

    print("KERNEL_OK")
</pallas_src>

<mosaic_0001>
module attributes {stable_mosaic.version = 11 : i64} {
  func.func @_user_emb_kernel(%arg0: i32, %arg1: memref<8x4xi32, #tpu.memory_space<vmem>>, %arg2: memref<48x128xf32, #tpu.memory_space<vmem>>, %arg3: memref<8x128xf32, #tpu.memory_space<vmem>>) attributes {dimension_semantics = [#tpu.dimension_semantics<parallel>], iteration_bounds = array<i64: 1>, scalar_prefetch = 0 : i64, scratch_operands = 0 : i64, tpu.core_type = #tpu.core_type<tc>, window_params = [{transform_indices = @transform_0, window_bounds = array<i64: 8, 4>}, {pipeline_mode = #tpu.pipeline_mode<synchronous>, transform_indices = @transform_1, window_bounds = array<i64: 48, 128>}, {transform_indices = @transform_2, window_bounds = array<i64: 8, 128>}]} {
    %c0 = arith.constant 0 : index
    %c0_0 = arith.constant 0 : index
    %0 = vector.load %arg1[%c0, %c0_0] : memref<8x4xi32, #tpu.memory_space<vmem>>, vector<8x4xi32>
    %1 = tpu.iota {dimensions = array<i32: 1>} : vector<8x48xi32>
    %false = arith.constant false
    %2 = vector.broadcast %false : i1 to vector<8x48xi1>
    %3 = vector.extract_strided_slice %0 {offsets = [0, 0], sizes = [8, 1], strides = [1, 1]} : vector<8x4xi32> to vector<8x1xi32>
    %c0_i32 = arith.constant 0 : i32
    %4 = vector.broadcast %c0_i32 : i32 to vector<8x1xi32>
    %5 = arith.addi %3, %4 : vector<8x1xi32>
    %6 = vector.extract_strided_slice %0 {offsets = [0, 1], sizes = [8, 1], strides = [1, 1]} : vector<8x4xi32> to vector<8x1xi32>
    %c8_i32 = arith.constant 8 : i32
    %7 = vector.broadcast %c8_i32 : i32 to vector<8x1xi32>
    %8 = arith.addi %6, %7 : vector<8x1xi32>
    %9 = vector.broadcast %5 : vector<8x1xi32> to vector<8x48xi32>
    %10 = arith.cmpi eq, %9, %1 : vector<8x48xi32>
    %11 = arith.ori %2, %10 : vector<8x48xi1>
    %12 = vector.broadcast %8 : vector<8x1xi32> to vector<8x48xi32>
    %13 = arith.cmpi eq, %12, %1 : vector<8x48xi32>
    %14 = arith.ori %11, %13 : vector<8x48xi1>
    %15 = vector.extract_strided_slice %0 {offsets = [0, 2], sizes = [8, 1], strides = [1, 1]} : vector<8x4xi32> to vector<8x1xi32>
    %c24_i32 = arith.constant 24 : i32
    %16 = vector.broadcast %c24_i32 : i32 to vector<8x1xi32>
    %17 = arith.addi %15, %16 : vector<8x1xi32>
    %18 = vector.extract_strided_slice %0 {offsets = [0, 3], sizes = [8, 1], strides = [1, 1]} : vector<8x4xi32> to vector<8x1xi32>
    %c32_i32 = arith.constant 32 : i32
    %19 = vector.broadcast %c32_i32 : i32 to vector<8x1xi32>
    %20 = arith.addi %18, %19 : vector<8x1xi32>
    %21 = vector.broadcast %17 : vector<8x1xi32> to vector<8x48xi32>
    %22 = arith.cmpi eq, %21, %1 : vector<8x48xi32>
    %23 = arith.ori %14, %22 : vector<8x48xi1>
    %24 = vector.broadcast %20 : vector<8x1xi32> to vector<8x48xi32>
    %25 = arith.cmpi eq, %24, %1 : vector<8x48xi32>
    %26 = arith.ori %23, %25 : vector<8x48xi1>
    %27 = arith.extui %26 : vector<8x48xi1> to vector<8x48xi32>
    %28 = arith.sitofp %27 : vector<8x48xi32> to vector<8x48xf32>
    %c0_1 = arith.constant 0 : index
    %c0_2 = arith.constant 0 : index
    %29 = vector.load %arg2[%c0_1, %c0_2] : memref<48x128xf32, #tpu.memory_space<vmem>>, vector<48x128xf32>
    %cst = arith.constant dense<0.000000e+00> : vector<8x128xf32>
    %30 = tpu.matmul %28, %29, %cst {dimension_numbers = #tpu.dot_dimension_numbers<[1], [0], [0], [1], [0, 0, 1, 1], [], []>} : vector<8x48xf32>, vector<48x128xf32>, vector<8x128xf32> -> vector<8x128xf32>
    %c0_3 = arith.constant 0 : index
    %c0_4 = arith.constant 0 : index
    %31 = vector.load %arg3[%c0_3, %c0_4] : memref<8x128xf32, #tpu.memory_space<vmem>>, vector<8x128xf32>
    tpu.vector_store %arg3[%c0_3, %c0_4], %30 {strides = array<i32>} : memref<8x128xf32, #tpu.memory_space<vmem>>, vector<8x128xf32>,
    return
  }
  func.func @transform_0(%arg0: i32) -> (i32, i32) {
    %c0_i32 = arith.constant 0 : i32
    %c0_i32_0 = arith.constant 0 : i32
    return %arg0, %c0_i32 : i32, i32
  }
  func.func @transform_1(%arg0: i32) -> (i32, i32) {
    %c0_i32 = arith.constant 0 : i32
    %c0_i32_0 = arith.constant 0 : i32
    %c0_i32_1 = arith.constant 0 : i32
    return %c0_i32, %c0_i32_0 : i32, i32
  }
  func.func @transform_2(%arg0: i32) -> (i32, i32) {
    %c0_i32 = arith.constant 0 : i32
    %c0_i32_0 = arith.constant 0 : i32
    return %arg0, %c0_i32 : i32, i32
  }
}

</mosaic_0001>

<bundles_post_ra>
// kernel: forward.1
= control target key start
LH: loop header
LB: loop body
LE: loop exit
PB: predicated region body
PF: predicated region fallthrough
CT: control target
= control target key end

     0   :  { %7 = vsyncpa [#allocation3], 0  ;;  %s210_s9 = smov [#allocation2]   ;;  %s253_s0 = inlined_call_operand.vmem [shape: s32[8,4], index: 0, kind: input, shape index: {}]   ;;  %s254_s1 = inlined_call_operand.hbm [shape: f32[48,128], index: 1, kind: input, shape index: {}]   ;;  %s255_s2 = inlined_call_operand.vmem [shape: f32[8,128], index: 2, kind: output, shape index: {}]  }
   0x1   :  { %s15_s10 = sshll.u32 %s210_s9, 4  ;;  %s186_s13 = scalar_lea.hbm %s254_s1, 768  ;;  %s16_s10 = int_to_ptr.vmem [resolvable:$true] %s15_s10 }
   0x2   :  { %p187_p0 = scmp.ne.s32.totalorder %s254_s1, %s186_s13  ;;  %p190_p1 = scmp.lt.u32.totalorder %s186_s13, %s254_s1 }
   0x4   :  { %p192_p2 = pnand %p190_p1, %p187_p0 }
   0x6   :  { %195 = shalt.err (!%p192_p2)
}
   0x7   :  { %s196_s18 = scalar_lea.vmem %s16_s10, 768  ;;  %p201_p4 = scmp.lt.s32.totalorder %s16_s10, %s16_s10 }
   0x8   :  { %p197_p3 = scmp.ne.s32.totalorder %s16_s10, %s196_s18  ;;  %p202_p5 = scmp.lt.s32.totalorder %s196_s18, %s196_s18 }
   0xa   :  { %p203_p6 = por %p202_p5, %p201_p4 }
   0xc   :  { %p204_p7 = pnand %p203_p6, %p197_p3 }
   0xe   :  { %207 = shalt.err (!%p204_p7)
}
   0xf   :  { %s211_s19 = smov 128   ;;  %s212_s20 = smov 8  }
  0x10   :  { %21 = dma.hbm_to_vmem [thread:$0]  %s254_s1, 768, %s16_s10, [#allocation3], %s211_s19, %s211_s19, %s212_s20  }
  0x11   :  { %208 = dma.done.wait [#allocation3], 768  }
  0x12   :  { %209 = vsyncadd [#allocation3], 4294966528  ;;  %v213_v0 = vmov 0   ;;  %v214_v1 = vmov 2   ;;  %v215_v2 = vmov 0.0|0.0   ;;  %v25_v3 = vld [vmem:[%s253_s0] sm:$0xff]  ;;  %v26_v19 = vlaneseq }
  0x13   :  { %181 = vset.pattern.permute.xlu0 %v213_v0  ;;  %183 = vset.pattern.permute.xlu1 %v214_v1  ;;  %v52_v4 = vld [vmem:[#allocation2] sm:$0xff]  ;;  %v53_v5 = vld [vmem:[#allocation2 + $0x8] sm:$0xff]  ;;  %v38_v6 = vadd.s32 24, %v25_v3  ;;  %v54_v8 = vld [vmem:[#allocation2 + $0x10] sm:$0xff]  ;;  %v28_v10 = vadd.s32 8, %v25_v3  ;;  %v39_v12 = vadd.s32 32, %v25_v3 }
  0x14   :  { %162 = vmatprep.subr.bf16.mxu0 %v215_v2  ;;  %30 = vperm.xlu0 %181, %v25_v3   ;;  %v163_v7 = vpack.c.bf16 %v53_v5, %v52_v4  ;;  %v55_v9 = vld [vmem:[#allocation2 + $0x18] sm:$0xff]  ;;  %v216_v13 = vmov 1   ;;  %v56_v14 = vld [vmem:[#allocation2 + $0x20] sm:$0xff]  ;;  %v57_v15 = vld [vmem:[#allocation2 + $0x28] sm:$0xff]  ;;  %v217_v16 = vmov 3   ;;  %vm218_vm0 = vmmov 0  }
  0x15   :  { %41 = vperm.xlu1 %183, %v38_v6   ;;  %v166_v11 = vpack.c.bf16 %v55_v9, %v54_v8  ;;  %v169_v17 = vpack.c.bf16 %v57_v15, %v56_v14  ;;  %v219_v18 = vmov 0.0   ;;  %v27_v21 = vand.u32 127, %v26_v19 }
  0x16   :  { %164 = vmatpush3.bf16.msra.mxu0 %v163_v7  ;;  %159 = vmatprep.mubr.msk.f32.mxu0 %vm218_vm0, %v219_v18  ;;  %vm58_vm7 = vcmask 392192  }
  0x17   :  { %165 = vmatprep.subr.bf16.mxu0 %v215_v2 }
  0x18   :  { %182 = vset.pattern.permute.xlu0 %v216_v13 }
  0x19   :  { %34 = vperm.xlu0 %182, %v28_v10   ;;  %184 = vset.pattern.permute.xlu1 %v217_v16 }
  0x1a   :  { %167 = vmatpush3.bf16.msra.mxu0 %v166_v11  ;;  %46 = vperm.xlu1 %184, %v39_v12  }
  0x1b   :  { %168 = vmatprep.subr.bf16.mxu0 %v215_v2 }
  0x1d   :  { %185 = vset.pattern.permute.xlu0 %v217_v16 }
  0x1e   :  { %170 = vmatpush3.bf16.msra.mxu0 %v169_v17 }
  0x93   :  { %v31_v20 = vpop.permute.xlu0 %30 }
  0x94   :  { %v42_v22 = vpop.permute.xlu1 %41  ;;  %vm32_vm1 = vcmp.eq.s32.totalorder %v31_v20, %v27_v21 }
  0x95   :  { %vm43_vm3 = vcmp.eq.s32.totalorder %v42_v22, %v27_v21 }
  0x98   :  { %v35_v23 = vpop.permute.xlu0 %34 }
  0x99   :  { %vm36_vm2 = vcmp.eq.s32.totalorder %v35_v23, %v27_v21  ;;  %v47_v24 = vpop.permute.xlu1 %46 }
  0x9a   :  { %vm37_vm4 = vmor %vm32_vm1, %vm36_vm2  ;;  %vm48_vm6 = vcmp.eq.s32.totalorder %v47_v24, %v27_v21 }
  0x9b   :  { %vm44_vm5 = vmor %vm37_vm4, %vm43_vm3 }
  0x9c   :  { %vm49_vm8 = vmor %vm44_vm5, %vm48_vm6 }
  0x9d   :  { %v138_v25 = vsel %vm49_vm8, 1.0, %v219_v18 }
  0x9e   :  { %160 = vmatmul.mubr.msk.f32.vlgmr.msra.gmra.mrb[0].mxu0 %vm58_vm7, %v138_v25 }
 0x171   :  { %v128_v26 = vpop.f32.mrb[0].mxu0 }
 0x172   :  { %132 = vst [vmem:[%s255_s2] sm:$0xff] %v128_v26  ;;  %v161_v27 = vpop.f32.mrb[1].mxu0 }
 0x173   :  { %137 = vsyncpa [#allocation3], 1 }

</bundles_post_ra>
